<compile_context>
chip_gen: v5e
topology: v5e:2x2
jax: 0.10.0
libtpu: 0.0.40
codegen_flags: <defaults>
</compile_context>

<pallas_src>
import functools

import jax
import jax.numpy as jnp
from jax.experimental import pallas as pl
from jax.experimental.pallas import tpu as pltpu

_LANE = 128


def _cdiv(a, b):
    return -(-a // b)


def _round_up(x, m):
    return ((x + m - 1) // m) * m


def _fast_recip(x):
    # EUP approximate reciprocal (frees VALU slots) + one Newton-Raphson step
    # -> matches an exact f32 divide to ~1 ulp for normal inputs.  For the
    # degenerate 1e-16 denominators of zero-area boxes it stays finite (no
    # NaN/inf), which is all the loss needs.
    r = pl.reciprocal(x, approx=True)
    return r * (2.0 - x * r)


def _compute_loss(pred_ref, tgt_ref, loss_type):
    # pred_ref / tgt_ref: (4, TM, 128) dense component planes (cx, cy, w, h).
    px = pred_ref[0].astype(jnp.float32)
    py = pred_ref[1].astype(jnp.float32)
    pw = pred_ref[2].astype(jnp.float32)
    ph = pred_ref[3].astype(jnp.float32)
    tx = tgt_ref[0].astype(jnp.float32)
    ty = tgt_ref[1].astype(jnp.float32)
    tw = tgt_ref[2].astype(jnp.float32)
    th = tgt_ref[3].astype(jnp.float32)

    phw, phh = pw * 0.5, ph * 0.5
    thw, thh = tw * 0.5, th * 0.5

    # Hoisted corners, reused by both the intersection and (for giou) the
    # enclosing box.
    p_x1, p_x2 = px - phw, px + phw
    p_y1, p_y2 = py - phh, py + phh
    g_x1, g_x2 = tx - thw, tx + thw
    g_y1, g_y2 = ty - thh, ty + thh

    tlx = jnp.maximum(p_x1, g_x1)
    tly = jnp.maximum(p_y1, g_y1)
    brx = jnp.minimum(p_x2, g_x2)
    bry = jnp.minimum(p_y2, g_y2)

    area_p = pw * ph
    area_g = tw * th

    en = ((tlx < brx) & (tly < bry)).astype(jnp.float32)
    area_i = (brx - tlx) * (bry - tly) * en
    iou = area_i * _fast_recip(area_p + area_g - area_i + 1e-16)

    if loss_type == "iou":
        return 1.0 - iou * iou
    elif loss_type == "giou":
        c_w = jnp.maximum(p_x2, g_x2) - jnp.minimum(p_x1, g_x1)
        c_h = jnp.maximum(p_y2, g_y2) - jnp.minimum(p_y1, g_y1)
        area_c = c_w * c_h
        giou = iou - (area_c - area_i) * _fast_recip(jnp.maximum(area_c, 1e-16))
        return 1.0 - jnp.clip(giou, -1.0, 1.0)
    raise ValueError(f"unknown loss_type {loss_type}")


def _iou_loss_kernel(pred_ref, tgt_ref, out_ref, *, loss_type):
    # reduction='none': emit the full lane/sublane-dense (TM, 128) loss slab.
    loss = _compute_loss(pred_ref, tgt_ref, loss_type)
    out_ref[...] = loss.astype(out_ref.dtype)


def _iou_loss_psum_kernel(pred_ref, tgt_ref, out_ref, *, loss_type, n_boxes, tm):
    # reduction='mean'/'sum': each grid step writes its own (8, 128)
    # partial-sum block -> no (rows, 128) slab ever touches HBM and the grid
    # axis remains safely "parallel" (no cross-step accumulator).
    loss = _compute_loss(pred_ref, tgt_ref, loss_type)  # (tm, 128) f32

    # Mask padded boxes to exactly 0 (n_boxes is static -> pure VPU work,
    # hidden under the DMA of this HBM-bound kernel).
    row = jax.lax.broadcasted_iota(jnp.int32, (tm, _LANE), 0)
    lane = jax.lax.broadcasted_iota(jnp.int32, (tm, _LANE), 1)
    idx = (pl.program_id(0) * tm + row) * _LANE + lane
    loss = jnp.where(idx < n_boxes, loss, 0.0)

    # Layout-preserving (tm,128) -> (tm//8, 8, 128) regroup; reduce over the
    # leading (vreg) axis: the cheapest reduction direction.
    out_ref[...] = jnp.sum(loss.reshape(tm // 8, 8, _LANE), axis=0)


def _choose_tiling(n, sub, block_rows):
    """Pick (tm, n_steps, rows) with bounded padding and few, large steps."""
    rows_needed = max(1, _cdiv(n, _LANE))
    block_rows = max(sub, min(_round_up(block_rows, sub), 2048))
    if rows_needed <= block_rows:
        n_steps = 1                       # single maximal tile (v5e/v6e: grid is serial)
    else:
        n_steps = _cdiv(rows_needed, block_rows)
        if n_steps % 2:                   # even step count balances v7x's 2 TensorCores
            n_steps += 1
    tm = _round_up(_cdiv(rows_needed, n_steps), sub)
    rows = n_steps * tm                   # padding bounded by ~sub rows per step
    return tm, n_steps, rows


def iou_loss(pred, target, *, reduction="none", loss_type="iou", block_rows=1024):
    """Pallas implementation of IOUloss.forward.

    pred, target: any shape flattening to (-1, 4), boxes as (cx, cy, w, h).
    """
    assert pred.shape[0] == target.shape[0]
    pred = pred.reshape(-1, 4)
    target = target.reshape(-1, 4)
    n = pred.shape[0]
    out_dtype = pred.dtype

    p_item = pred.dtype.itemsize
    t_item = target.dtype.itemsize
    o_item = jnp.dtype(out_dtype).itemsize
    # Sublane multiple respecting packed-dtype tiling: 8 (f32), 16 (bf16), 32 (8-bit).
    sub = max(8, 32 // max(1, min(p_item, t_item, o_item)))

    tm, n_steps, rows = _choose_tiling(n, sub, block_rows)
    n_pad = rows * _LANE

    def to_planes(x):
        # Single fused XLA copy per input: pad + transpose + reshape to
        # (4, rows, 128) component planes (see TODO(synk) at top of file).
        if n_pad != n:
            x = jnp.pad(x, ((0, n_pad - n), (0, 0)))
        return x.T.reshape(4, rows, _LANE)

    pred_t = to_planes(pred)
    tgt_t = to_planes(target)

    reduce_in_kernel = reduction in ("mean", "sum")

    if reduce_in_kernel:
        kernel = functools.partial(
            _iou_loss_psum_kernel, loss_type=loss_type, n_boxes=n, tm=tm)
        out_shape = jax.ShapeDtypeStruct((n_steps * 8, _LANE), jnp.float32)
        out_spec = pl.BlockSpec((8, _LANE), lambda i: (i, 0))
        out_block_bytes = 8 * _LANE * 4
    else:
        kernel = functools.partial(_iou_loss_kernel, loss_type=loss_type)
        out_shape = jax.ShapeDtypeStruct((rows, _LANE), out_dtype)
        out_spec = pl.BlockSpec((tm, _LANE), lambda i: (i, 0))
        out_block_bytes = tm * _LANE * o_item

    # Keep default double-buffering (no pl.Buffered(3) -- review).  Only set
    # an explicit scoped-VMEM limit when the tile actually needs more than
    # v5e's 16 MiB default (tm > ~1024 rows of f32).
    vmem_est = 2 * (4 * tm * _LANE * (p_item + t_item)) + 2 * out_block_bytes
    cp_kwargs = dict(dimension_semantics=("parallel",))
    if vmem_est > 14 * (1 << 20):
        cp_kwargs["vmem_limit_bytes"] = min(int(vmem_est * 3 // 2), 48 << 20)

    out = pl.pallas_call(
        kernel,
        out_shape=out_shape,
        grid_spec=pltpu.PrefetchScalarGridSpec(
            num_scalar_prefetch=0,
            grid=(n_steps,),
            in_specs=[
                pl.BlockSpec((4, tm, _LANE), lambda i: (0, i, 0)),
                pl.BlockSpec((4, tm, _LANE), lambda i: (0, i, 0)),
            ],
            out_specs=out_spec,
        ),
        compiler_params=pltpu.CompilerParams(**cp_kwargs),
    )(pred_t, tgt_t)

    if reduce_in_kernel:
        total = jnp.sum(out)                      # tiny (n_steps*8, 128) array
        if reduction == "mean":
            total = total / jnp.float32(max(n, 1))
        return total.astype(out_dtype)

    # lane-dense slab -> flat per-box loss; drop padded boxes.
    flat = out.reshape(-1)
    return flat if flat.shape[0] == n else flat[:n]


def _iou_loss_ref(pred, target, reduction="none", loss_type="iou"):
    # pure-JAX reference, mirrors the PyTorch code exactly
    pred = pred.reshape(-1, 4)
    target = target.reshape(-1, 4)
    tl = jnp.maximum(pred[:, :2] - pred[:, 2:] / 2, target[:, :2] - target[:, 2:] / 2)
    br = jnp.minimum(pred[:, :2] + pred[:, 2:] / 2, target[:, :2] + target[:, 2:] / 2)
    area_p = jnp.prod(pred[:, 2:], 1)
    area_g = jnp.prod(target[:, 2:], 1)
    en = jnp.prod((tl < br).astype(tl.dtype), axis=1)
    area_i = jnp.prod(br - tl, 1) * en
    iou = area_i / (area_p + area_g - area_i + 1e-16)
    if loss_type == "iou":
        loss = 1 - iou ** 2
    elif loss_type == "giou":
        c_tl = jnp.minimum(pred[:, :2] - pred[:, 2:] / 2, target[:, :2] - target[:, 2:] / 2)
        c_br = jnp.maximum(pred[:, :2] + pred[:, 2:] / 2, target[:, :2] + target[:, 2:] / 2)
        area_c = jnp.prod(c_br - c_tl, 1)
        giou = iou - (area_c - area_i) / jnp.maximum(area_c, 1e-16)
        loss = 1 - jnp.clip(giou, -1.0, 1.0)
    if reduction == "mean":
        loss = loss.mean()
    elif reduction == "sum":
        loss = loss.sum()
    return loss


if __name__ == "__main__":
    key = jax.random.PRNGKey(0)

    ok = True
    # (50, default block_rows): single-step grid + lane padding.
    # (2500, block_rows=8): forces a multi-step (even) grid + masked tail.
    for n_boxes, blk in ((50, 1024), (2500, 8)):
        k1, k2, k3, k4, key = jax.random.split(key, 5)
        pred = jnp.concatenate(
            [jax.random.uniform(k1, (n_boxes, 2), jnp.float32, 0.0, 10.0),
             jax.random.uniform(k2, (n_boxes, 2), jnp.float32, 0.5, 3.0)], axis=1)
        target = jnp.concatenate(
            [jax.random.uniform(k3, (n_boxes, 2), jnp.float32, 0.0, 10.0),
             jax.random.uniform(k4, (n_boxes, 2), jnp.float32, 0.5, 3.0)], axis=1)

        for loss_type in ("iou", "giou"):
            for reduction in ("none", "mean", "sum"):
                out = iou_loss(pred, target, reduction=reduction,
                               loss_type=loss_type, block_rows=blk)
                out = jax.block_until_ready(out)
                ref = _iou_loss_ref(pred, target, reduction=reduction,
                                    loss_type=loss_type)
                if not jnp.allclose(out, ref, atol=1e-3, rtol=1e-3):
                    ok = False

    print("KERNEL_OK" if ok else "KERNEL_MISMATCH")
</pallas_src>

<mosaic_0001>
module attributes {stable_mosaic.version = 11 : i64} {
  func.func @_iou_loss_kernel(%arg0: i32, %arg1: memref<4x8x128xf32, #tpu.memory_space<vmem>>, %arg2: memref<4x8x128xf32, #tpu.memory_space<vmem>>, %arg3: memref<8x128xf32, #tpu.memory_space<vmem>>) attributes {dimension_semantics = [#tpu.dimension_semantics<parallel>], iteration_bounds = array<i64: 1>, scalar_prefetch = 0 : i64, scratch_operands = 0 : i64, tpu.core_type = #tpu.core_type<tc>, window_params = [{transform_indices = @transform_0, window_bounds = array<i64: 4, 8, 128>}, {transform_indices = @transform_1, window_bounds = array<i64: 4, 8, 128>}, {transform_indices = @transform_2, window_bounds = array<i64: 8, 128>}]} {
    %c0 = arith.constant 0 : index
    %c0_0 = arith.constant 0 : index
    %c0_1 = arith.constant 0 : index
    %0 = vector.load %arg1[%c0, %c0_0, %c0_1] : memref<4x8x128xf32, #tpu.memory_space<vmem>>, vector<1x8x128xf32>
    %1 = vector.shape_cast %0 : vector<1x8x128xf32> to vector<8x128xf32>
    %c1 = arith.constant 1 : index
    %c0_2 = arith.constant 0 : index
    %c0_3 = arith.constant 0 : index
    %2 = vector.load %arg1[%c1, %c0_2, %c0_3] : memref<4x8x128xf32, #tpu.memory_space<vmem>>, vector<1x8x128xf32>
    %3 = vector.shape_cast %2 : vector<1x8x128xf32> to vector<8x128xf32>
    %c2 = arith.constant 2 : index
    %c0_4 = arith.constant 0 : index
    %c0_5 = arith.constant 0 : index
    %4 = vector.load %arg1[%c2, %c0_4, %c0_5] : memref<4x8x128xf32, #tpu.memory_space<vmem>>, vector<1x8x128xf32>
    %5 = vector.shape_cast %4 : vector<1x8x128xf32> to vector<8x128xf32>
    %c3 = arith.constant 3 : index
    %c0_6 = arith.constant 0 : index
    %c0_7 = arith.constant 0 : index
    %6 = vector.load %arg1[%c3, %c0_6, %c0_7] : memref<4x8x128xf32, #tpu.memory_space<vmem>>, vector<1x8x128xf32>
    %7 = vector.shape_cast %6 : vector<1x8x128xf32> to vector<8x128xf32>
    %c0_8 = arith.constant 0 : index
    %c0_9 = arith.constant 0 : index
    %c0_10 = arith.constant 0 : index
    %8 = vector.load %arg2[%c0_8, %c0_9, %c0_10] : memref<4x8x128xf32, #tpu.memory_space<vmem>>, vector<1x8x128xf32>
    %9 = vector.shape_cast %8 : vector<1x8x128xf32> to vector<8x128xf32>
    %c1_11 = arith.constant 1 : index
    %c0_12 = arith.constant 0 : index
    %c0_13 = arith.constant 0 : index
    %10 = vector.load %arg2[%c1_11, %c0_12, %c0_13] : memref<4x8x128xf32, #tpu.memory_space<vmem>>, vector<1x8x128xf32>
    %11 = vector.shape_cast %10 : vector<1x8x128xf32> to vector<8x128xf32>
    %c2_14 = arith.constant 2 : index
    %c0_15 = arith.constant 0 : index
    %c0_16 = arith.constant 0 : index
    %12 = vector.load %arg2[%c2_14, %c0_15, %c0_16] : memref<4x8x128xf32, #tpu.memory_space<vmem>>, vector<1x8x128xf32>
    %13 = vector.shape_cast %12 : vector<1x8x128xf32> to vector<8x128xf32>
    %c3_17 = arith.constant 3 : index
    %c0_18 = arith.constant 0 : index
    %c0_19 = arith.constant 0 : index
    %14 = vector.load %arg2[%c3_17, %c0_18, %c0_19] : memref<4x8x128xf32, #tpu.memory_space<vmem>>, vector<1x8x128xf32>
    %15 = vector.shape_cast %14 : vector<1x8x128xf32> to vector<8x128xf32>
    %cst = arith.constant 5.000000e-01 : f32
    %16 = vector.broadcast %cst : f32 to vector<8x128xf32>
    %17 = arith.mulf %5, %16 : vector<8x128xf32>
    %cst_20 = arith.constant 5.000000e-01 : f32
    %18 = vector.broadcast %cst_20 : f32 to vector<8x128xf32>
    %19 = arith.mulf %7, %18 : vector<8x128xf32>
    %cst_21 = arith.constant 5.000000e-01 : f32
    %20 = vector.broadcast %cst_21 : f32 to vector<8x128xf32>
    %21 = arith.mulf %13, %20 : vector<8x128xf32>
    %cst_22 = arith.constant 5.000000e-01 : f32
    %22 = vector.broadcast %cst_22 : f32 to vector<8x128xf32>
    %23 = arith.mulf %15, %22 : vector<8x128xf32>
    %24 = arith.subf %1, %17 : vector<8x128xf32>
    %25 = arith.addf %1, %17 : vector<8x128xf32>
    %26 = arith.subf %3, %19 : vector<8x128xf32>
    %27 = arith.addf %3, %19 : vector<8x128xf32>
    %28 = arith.subf %9, %21 : vector<8x128xf32>
    %29 = arith.addf %9, %21 : vector<8x128xf32>
    %30 = arith.subf %11, %23 : vector<8x128xf32>
    %31 = arith.addf %11, %23 : vector<8x128xf32>
    %32 = arith.maximumf %24, %28 : vector<8x128xf32>
    %33 = arith.maximumf %26, %30 : vector<8x128xf32>
    %34 = arith.minimumf %25, %29 : vector<8x128xf32>
    %35 = arith.minimumf %27, %31 : vector<8x128xf32>
    %36 = arith.mulf %5, %7 : vector<8x128xf32>
    %37 = arith.mulf %13, %15 : vector<8x128xf32>
    %38 = arith.cmpf olt, %32, %34 : vector<8x128xf32>
    %39 = arith.cmpf olt, %33, %35 : vector<8x128xf32>
    %40 = arith.andi %38, %39 : vector<8x128xi1>
    %41 = arith.extui %40 : vector<8x128xi1> to vector<8x128xi32>
    %42 = arith.sitofp %41 : vector<8x128xi32> to vector<8x128xf32>
    %43 = arith.subf %34, %32 : vector<8x128xf32>
    %44 = arith.subf %35, %33 : vector<8x128xf32>
    %45 = arith.mulf %43, %44 : vector<8x128xf32>
    %46 = arith.mulf %45, %42 : vector<8x128xf32>
    %47 = arith.addf %36, %37 : vector<8x128xf32>
    %48 = arith.subf %47, %46 : vector<8x128xf32>
    %cst_23 = arith.constant 1.000000e-16 : f32
    %49 = vector.broadcast %cst_23 : f32 to vector<8x128xf32>
    %50 = arith.addf %48, %49 : vector<8x128xf32>
    %51 = tpu.reciprocal %50 {approx = true} : vector<8x128xf32> -> vector<8x128xf32>
    %52 = arith.mulf %50, %51 : vector<8x128xf32>
    %cst_24 = arith.constant 2.000000e+00 : f32
    %53 = vector.broadcast %cst_24 : f32 to vector<8x128xf32>
    %54 = arith.subf %53, %52 : vector<8x128xf32>
    %55 = arith.mulf %51, %54 : vector<8x128xf32>
    %56 = arith.mulf %46, %55 : vector<8x128xf32>
    %57 = arith.mulf %56, %56 : vector<8x128xf32>
    %cst_25 = arith.constant 1.000000e+00 : f32
    %58 = vector.broadcast %cst_25 : f32 to vector<8x128xf32>
    %59 = arith.subf %58, %57 : vector<8x128xf32>
    %c0_26 = arith.constant 0 : index
    %c0_27 = arith.constant 0 : index
    %60 = vector.load %arg3[%c0_26, %c0_27] : memref<8x128xf32, #tpu.memory_space<vmem>>, vector<8x128xf32>
    tpu.vector_store %arg3[%c0_26, %c0_27], %59 {strides = array<i32>} : memref<8x128xf32, #tpu.memory_space<vmem>>, vector<8x128xf32>,
    return
  }
  func.func @transform_0(%arg0: i32) -> (i32, i32, i32) {
    %c0_i32 = arith.constant 0 : i32
    %c0_i32_0 = arith.constant 0 : i32
    %c0_i32_1 = arith.constant 0 : i32
    return %c0_i32, %arg0, %c0_i32_0 : i32, i32, i32
  }
  func.func @transform_1(%arg0: i32) -> (i32, i32, i32) {
    %c0_i32 = arith.constant 0 : i32
    %c0_i32_0 = arith.constant 0 : i32
    %c0_i32_1 = arith.constant 0 : i32
    return %c0_i32, %arg0, %c0_i32_0 : i32, i32, i32
  }
  func.func @transform_2(%arg0: i32) -> (i32, i32) {
    %c0_i32 = arith.constant 0 : i32
    %c0_i32_0 = arith.constant 0 : i32
    return %arg0, %c0_i32 : i32, i32
  }
}

</mosaic_0001>

<bundles_post_ra>
// kernel: tpu_custom_call.1
= control target key start
LH: loop header
LB: loop body
LE: loop exit
PB: predicated region body
PF: predicated region fallthrough
CT: control target
= control target key end

     0   :  { %7 = vsyncpa [#allocation3], 0  ;;  %s231_s0 = inlined_call_operand.hbm [shape: f32[4,8,128], index: 0, kind: input, shape index: {}]   ;;  %s232_s1 = inlined_call_operand.hbm [shape: f32[4,8,128], index: 1, kind: input, shape index: {}]   ;;  %s233_s2 = inlined_call_operand.hbm [shape: f32[8,128], index: 2, kind: output, shape index: {}]  }
   0x1   :  { %8 = vsyncpa [#allocation6], 0 }
   0x2   :  { %9 = vsyncpa [#allocation4], 0  ;;  %s14_s11 = sshll.u32 %s231_s0, 4  ;;  %s201_s12 = smov [#allocation2]   ;;  %s15_s11 = int_to_ptr.hbm [resolvable:$true] %s14_s11 }
   0x3   :  { %s16_s13 = sshll.u32 %s201_s12, 4  ;;  %s27_s16 = sshll.u32 %s232_s1, 4  ;;  %s17_s13 = int_to_ptr.vmem [resolvable:$true] %s16_s13  ;;  %s28_s16 = int_to_ptr.hbm [resolvable:$true] %s27_s16 }
   0x4   :  { %s202_s17 = smov 128   ;;  %s203_s18 = smov 8  }
   0x5   :  { %22 = dma.hbm_to_vmem [thread:$0]  %s15_s11, 512, %s17_s13, [#allocation3], %s202_s17, %s202_s17, %s203_s18  }
   0x6   :  { %s204_s19 = smov [#allocation5]  }
   0x7   :  { %s29_s20 = sshll.u32 %s204_s19, 4  ;;  %s30_s20 = int_to_ptr.vmem [resolvable:$true] %s29_s20 }
   0x8   :  { %35 = dma.hbm_to_vmem [thread:$0]  %s28_s16, 512, %s30_s20, [#allocation6], %s202_s17, %s202_s17, %s203_s18  }
   0x9   :  { %195 = dma.done.wait [#allocation3], 512  }
   0xa   :  { %196 = vsyncadd [#allocation3], 4294966784 }
   0xb   :  { %197 = dma.done.wait [#allocation6], 512  }
   0xc   :  { %198 = vsyncadd [#allocation6], 4294966784  ;;  %v44_v0 = vld [vmem:[#allocation2] sm:$0xff]  ;;  %v48_v1 = vld [vmem:[#allocation2 + $0x10] sm:$0xff]  ;;  %v205_v28 = vmov 0.0   ;;  %s206_s0 = smov [#allocation7]  }
   0xd   :  { %v46_v2 = vld [vmem:[#allocation2 + $0x8] sm:$0xff]  ;;  %v50_v3 = vld [vmem:[#allocation2 + $0x18] sm:$0xff]  ;;  %v51_v4 = vld [vmem:[#allocation5] sm:$0xff]  ;;  %v58_v5 = vmul.f32 0.5, %v48_v1  ;;  %s101_s1 = sshll.u32 %s206_s0, 4  ;;  %s103_s23 = sshll.u32 %s233_s2, 4  ;;  %s102_s1 = int_to_ptr.vmem [resolvable:$true] %s101_s1  ;;  %s104_s23 = int_to_ptr.hbm [resolvable:$true] %s103_s23 }
   0xe   :  { %v53_v6 = vld [vmem:[#allocation5 + $0x8] sm:$0xff]  ;;  %v55_v7 = vld [vmem:[#allocation5 + $0x10] sm:$0xff]  ;;  %v57_v8 = vld [vmem:[#allocation5 + $0x18] sm:$0xff]  ;;  %v59_v9 = vmul.f32 0.5, %v50_v3  ;;  %v74_v20 = vmul.f32 %v50_v3, %v48_v1 }
   0xf   :  { %v60_v10 = vmul.f32 0.5, %v55_v7  ;;  %v61_v11 = vmul.f32 0.5, %v57_v8  ;;  %v62_v12 = vsub.f32 %v44_v0, %v58_v5  ;;  %v63_v13 = vadd.f32 %v58_v5, %v44_v0 }
  0x10   :  { %v64_v14 = vsub.f32 %v46_v2, %v59_v9  ;;  %v65_v15 = vadd.f32 %v59_v9, %v46_v2  ;;  %v75_v21 = vmul.f32 %v57_v8, %v55_v7 }
  0x11   :  { %v66_v16 = vsub.f32 %v51_v4, %v60_v10  ;;  %v67_v17 = vadd.f32 %v60_v10, %v51_v4  ;;  %v68_v18 = vsub.f32 %v53_v6, %v61_v11  ;;  %v69_v19 = vadd.f32 %v61_v11, %v53_v6 }
  0x12   :  { %v85_v31 = vadd.f32 %v75_v21, %v74_v20 }
  0x13   :  { %v70_v22 = vmax.f32 %v62_v12, %v66_v16  ;;  %v71_v23 = vmax.f32 %v64_v14, %v68_v18  ;;  %v72_v24 = vmin.f32 %v63_v13, %v67_v17  ;;  %v73_v25 = vmin.f32 %v65_v15, %v69_v19 }
  0x15   :  { %vm76_vm0 = vcmp.lt.f32.partialorder %v70_v22, %v72_v24  ;;  %vm77_vm1 = vcmp.lt.f32.partialorder %v71_v23, %v73_v25  ;;  %v81_v26 = vsub.f32 %v72_v24, %v70_v22  ;;  %v82_v27 = vsub.f32 %v73_v25, %v71_v23 }
  0x16   :  { %vm78_vm2 = vmand %vm76_vm0, %vm77_vm1 }
  0x17   :  { %v114_v29 = vsel %vm78_vm2, 1.0, %v205_v28  ;;  %v83_v30 = vmul.f32 %v82_v27, %v81_v26 }
  0x19   :  { %v84_v32 = vmul.f32 %v114_v29, %v83_v30 }
  0x1b   :  { %v86_v33 = vsub.f32 %v85_v31, %v84_v32 }
  0x1d   :  { %v87_v34 = vadd.f32 1e-16, %v86_v33 }
  0x1f   :  { %121 = vrcp.f32 %v87_v34 }
  0x25   :  { %v122_v35 = vpop.eup %121 }
  0x26   :  { %v89_v36 = vmul.f32 %v122_v35, %v87_v34 }
  0x28   :  { %v90_v37 = vsub.f32 2.0, %v89_v36 }
  0x2a   :  { %v91_v38 = vmul.f32 %v122_v35, %v90_v37 }
  0x2c   :  { %v92_v39 = vmul.f32 %v91_v38, %v84_v32 }
  0x2e   :  { %v93_v40 = vmul.f32 %v92_v39, %v92_v39 }
  0x30   :  { %v94_v41 = vsub.f32 1.0, %v93_v40 }
  0x32   :  { %95 = vst [vmem:[#allocation7] sm:$0xff] %v94_v41 }
  0x33   :  { %106 = dma.vmem_to_hbm [thread:$0]  %s102_s1, 128, %s104_s23, [#allocation4]  }
  0x34   :  { %199 = dma.done.wait [#allocation4], 128  }
  0x35   :  { %200 = vsyncadd [#allocation4], 4294967168 }
  0x36   :  { %111 = vsyncpa [#allocation3], 1 }
  0x37   :  { %112 = vsyncpa [#allocation6], 1 }
  0x38   :  { %113 = vsyncpa [#allocation4], 1 }

</bundles_post_ra>
